<compile_context>
chip_gen: v7x
topology: tpu7x:2x2x1
jax: 0.10.0
libtpu: 0.0.40
codegen_flags: <defaults>
</compile_context>

<pallas_src>
import functools

import jax
import jax.numpy as jnp
from jax.experimental import pallas as pl
from jax.experimental.pallas import tpu as pltpu

_INV_SQRT2 = 0.7071067811865476


def _round_up(n, m):
    return ((n + m - 1) // m) * m


def _mlp_head_kernel(num_layers, x_ref, *refs):
    """refs = (w1, b1, ..., wL, bL, out_ref). One batch tile per grid step."""
    out_ref = refs[-1]
    params = refs[:-1]

    # bf16 cast happens here (no wrapper-side materialization of a padded copy).
    h = x_ref[...].astype(jnp.bfloat16)                 # (TB, F) -> bf16 MXU operand
    for i in range(num_layers):
        w = params[2 * i][...]                          # bf16 (in, out_pad)
        b = params[2 * i + 1][...]                      # f32  (1, out_pad), broadcasts
        h32 = jnp.dot(h, w, preferred_element_type=jnp.float32) + b
        if i < num_layers - 1:
            # exact (erf-based) GELU -- matches torch.nn.GELU() default
            h32 = 0.5 * h32 * (1.0 + jax.lax.erf(h32 * _INV_SQRT2))
            # nn.Dropout(p=0.5) is identity in eval mode.
            h = h32.astype(jnp.bfloat16)                # bf16 into the next MXU matmul
        else:
            h = h32

    # Padded output lanes carry bias = -30 => sigmoid ~ 1e-13, so no in-kernel
    # iota mask is needed before the row sum.
    y = jax.nn.sigmoid(h)                               # f32 (TB, OUT_pad)
    denom = jnp.sum(y, axis=1, keepdims=True)
    y = y * pl.reciprocal(denom, approx=False)          # exact: rows sum to 1 (f32)
    out_ref[...] = y.astype(out_ref.dtype)


def aesthetic_score_predictor(x, params, model_type, *, batch_tile=1024,
                              out_dtype=jnp.float32):
    """x: (B, feature_dim) f32. params: list of (W (in,out), b (1,out)) per Linear."""
    num_layers = {"1fc": 1, "3fc": 2, "5fc": 3}[model_type]
    assert len(params) == num_layers

    B, F = x.shape
    out_ch = params[-1][0].shape[1]

    # Only the OUTPUT dims of each layer get padded to 128 lanes; the first
    # layer's contraction dim stays at the raw feature_dim (x is unpadded).
    dims_out = [w.shape[1] for (w, _) in params]
    dims_out_p = [_round_up(d, 128) for d in dims_out]
    dims_in_p = [F] + dims_out_p[:-1]
    OUT_pad = dims_out_p[-1]

    # Batch tiling: 16-row granularity (bf16 packs 2 rows/sublane), >= 2 grid
    # steps when the batch allows it so v7x megacore splits the batch axis.
    B_pad = _round_up(B, 16)
    if B_pad >= 32:
        TB = min(batch_tile, _round_up(-(-B_pad // 2), 16))
    else:
        TB = B_pad
    B_pad = _round_up(B_pad, TB)

    # Only materialize a padded copy of x when the batch is not tile-aligned.
    if B_pad != B:
        x_in = jnp.zeros((B_pad, F), x.dtype).at[:B].set(x)
    else:
        x_in = x

    # Pad weights (bf16) along lane dims; biases stay f32.  Last layer's padded
    # bias lanes are set to -30 so sigmoid() -> ~0 there (lane-mask baked in);
    # hidden-layer padded bias lanes stay 0 so GELU(0)=0 keeps them inert.
    flat = []
    for li, ((w, b), ip, op) in enumerate(zip(params, dims_in_p, dims_out_p)):
        w_p = jnp.zeros((ip, op), jnp.bfloat16).at[: w.shape[0], : w.shape[1]].set(
            w.astype(jnp.bfloat16))
        if li == num_layers - 1:
            b_p = jnp.full((1, op), -30.0, jnp.float32).at[:, : b.shape[1]].set(
                b.astype(jnp.float32))
        else:
            b_p = jnp.zeros((1, op), jnp.float32).at[:, : b.shape[1]].set(
                b.astype(jnp.float32))
        flat.extend([w_p, b_p])

    kernel = functools.partial(_mlp_head_kernel, num_layers)

    grid = (B_pad // TB,)
    in_specs = [pl.BlockSpec((TB, F), lambda i: (i, 0))]
    for ip, op in zip(dims_in_p, dims_out_p):
        in_specs.append(pl.BlockSpec((ip, op), lambda i: (0, 0)))   # weights: resident
        in_specs.append(pl.BlockSpec((1, op), lambda i: (0, 0)))    # biases: resident
    out_spec = pl.BlockSpec((TB, OUT_pad), lambda i: (i, 0))        # lane-dense store

    out_itemsize = jnp.dtype(out_dtype).itemsize
    flops = 2 * B_pad * sum(ip * op for ip, op in zip(dims_in_p, dims_out_p))
    transcendentals = B_pad * (sum(dims_out_p[:-1]) + OUT_pad + 1)  # erf + sigmoid + rcp
    bytes_accessed = (
        x_in.size * x_in.dtype.itemsize
        + sum(a.size * a.dtype.itemsize for a in flat)
        + B_pad * OUT_pad * out_itemsize
    )

    out_padded = pl.pallas_call(
        kernel,
        out_shape=jax.ShapeDtypeStruct((B_pad, OUT_pad), out_dtype),
        grid=grid,
        in_specs=in_specs,
        out_specs=out_spec,
        compiler_params=pltpu.CompilerParams(
            dimension_semantics=("parallel",),          # megacore split on v7x
            vmem_limit_bytes=32 * 1024 * 1024,          # safe on v5e/v6e/v7x
        ),
        cost_estimate=pl.CostEstimate(
            flops=flops,
            transcendentals=transcendentals,
            bytes_accessed=bytes_accessed,
        ),
    )(x_in, *flat)

    return out_padded[:B, :out_ch].astype(jnp.float32)


def _init_linear(key, fan_in, fan_out):
    """Deterministic PyTorch-style (kaiming-uniform-ish) init; W stored as (in, out)."""
    kw, kb = jax.random.split(key)
    bound = 1.0 / jnp.sqrt(jnp.float32(fan_in))
    w = jax.random.uniform(kw, (fan_in, fan_out), jnp.float32, -bound, bound)
    b = jax.random.uniform(kb, (1, fan_out), jnp.float32, -bound, bound)
    return w, b


def _reference_f32(x, params):
    h = x
    for i, (w, b) in enumerate(params):
        h = h @ w + b
        if i < len(params) - 1:
            h = 0.5 * h * (1.0 + jax.lax.erf(h * _INV_SQRT2))
    y = jax.nn.sigmoid(h)
    return y / jnp.sum(y, axis=1, keepdims=True)


def _reference_bf16(x, params):
    """Mirror of the kernel's precision path (bf16 operands, f32 accumulation)."""
    h = x.astype(jnp.bfloat16)
    for i, (w, b) in enumerate(params):
        h = jnp.dot(h, w.astype(jnp.bfloat16), preferred_element_type=jnp.float32) + b
        if i < len(params) - 1:
            h = 0.5 * h * (1.0 + jax.lax.erf(h * _INV_SQRT2))
            h = h.astype(jnp.bfloat16)
    y = jax.nn.sigmoid(h)
    return y / jnp.sum(y, axis=1, keepdims=True)


if __name__ == "__main__":
    # opt.model_type = '3fc', feature_dims = [32], hidden_dim = 32, out_channels = 10
    model_type = "3fc"
    batch, feature_dim, hidden_dim, out_channels = 8, 32, 32, 10

    key = jax.random.PRNGKey(0)
    kx, k1, k2, k3 = jax.random.split(key, 4)

    x = jax.random.normal(kx, (batch, feature_dim), jnp.float32)

    if model_type == "1fc":
        dims = [(feature_dim, out_channels)]
        layer_keys = [k1]
    elif model_type == "3fc":
        dims = [(feature_dim, hidden_dim), (hidden_dim, out_channels)]
        layer_keys = [k1, k2]
    else:  # '5fc'
        dims = [(feature_dim, hidden_dim), (hidden_dim, hidden_dim), (hidden_dim, out_channels)]
        layer_keys = [k1, k2, k3]

    params = [_init_linear(k, fi, fo) for k, (fi, fo) in zip(layer_keys, dims)]

    out = aesthetic_score_predictor(x, params, model_type)
    out = jax.block_until_ready(out)

    ref32 = _reference_f32(x, params)
    refbf = _reference_bf16(x, params)

    assert out.shape == (batch, out_channels)
    # loose check vs full-f32 reference (bf16 operands introduce ~1e-3 level error)
    assert jnp.allclose(out, ref32, atol=2e-2, rtol=2e-2), "kernel/f32-reference mismatch"
    # tight check vs precision-matched reference
    assert jnp.allclose(out, refbf, atol=2e-3, rtol=2e-3), "kernel/bf16-reference mismatch"
    assert jnp.allclose(jnp.sum(out, axis=1), 1.0, atol=1e-3), "rows should sum to 1"

    print("KERNEL_OK")
</pallas_src>

<mosaic_0001>
module attributes {stable_mosaic.version = 11 : i64} {
  func.func @_mlp_head_kernel(%arg0: i32, %arg1: memref<16x32xf32, #tpu.memory_space<vmem>>, %arg2: memref<32x128xbf16, #tpu.memory_space<vmem>>, %arg3: memref<1x128xf32, #tpu.memory_space<vmem>>, %arg4: memref<128x128xbf16, #tpu.memory_space<vmem>>, %arg5: memref<1x128xf32, #tpu.memory_space<vmem>>, %arg6: memref<16x128xf32, #tpu.memory_space<vmem>>) attributes {dimension_semantics = [#tpu.dimension_semantics<parallel>], iteration_bounds = array<i64: 1>, scalar_prefetch = 0 : i64, scratch_operands = 0 : i64, tpu.core_type = #tpu.core_type<tc>, window_params = [{transform_indices = @transform_0, window_bounds = array<i64: 16, 32>}, {pipeline_mode = #tpu.pipeline_mode<synchronous>, transform_indices = @transform_1, window_bounds = array<i64: 32, 128>}, {pipeline_mode = #tpu.pipeline_mode<synchronous>, transform_indices = @transform_2, window_bounds = array<i64: 1, 128>}, {pipeline_mode = #tpu.pipeline_mode<synchronous>, transform_indices = @transform_3, window_bounds = array<i64: 128, 128>}, {pipeline_mode = #tpu.pipeline_mode<synchronous>, transform_indices = @transform_4, window_bounds = array<i64: 1, 128>}, {transform_indices = @transform_5, window_bounds = array<i64: 16, 128>}]} {
    %c0 = arith.constant 0 : index
    %c0_0 = arith.constant 0 : index
    %0 = vector.load %arg1[%c0, %c0_0] : memref<16x32xf32, #tpu.memory_space<vmem>>, vector<16x32xf32>
    %1 = arith.truncf %0 : vector<16x32xf32> to vector<16x32xbf16>
    %c0_1 = arith.constant 0 : index
    %c0_2 = arith.constant 0 : index
    %2 = vector.load %arg2[%c0_1, %c0_2] : memref<32x128xbf16, #tpu.memory_space<vmem>>, vector<32x128xbf16>
    %c0_3 = arith.constant 0 : index
    %c0_4 = arith.constant 0 : index
    %3 = vector.load %arg3[%c0_3, %c0_4] : memref<1x128xf32, #tpu.memory_space<vmem>>, vector<1x128xf32>
    %cst = arith.constant dense<0.000000e+00> : vector<16x128xf32>
    %4 = tpu.matmul %1, %2, %cst {dimension_numbers = #tpu.dot_dimension_numbers<[1], [0], [0], [1], [0, 0, 1, 1], [], []>} : vector<16x32xbf16>, vector<32x128xbf16>, vector<16x128xf32> -> vector<16x128xf32>
    %5 = vector.broadcast %3 : vector<1x128xf32> to vector<16x128xf32>
    %6 = arith.addf %4, %5 : vector<16x128xf32>
    %cst_5 = arith.constant 5.000000e-01 : f32
    %7 = vector.broadcast %cst_5 : f32 to vector<16x128xf32>
    %8 = arith.mulf %7, %6 : vector<16x128xf32>
    %cst_6 = arith.constant 0.707106769 : f32
    %9 = vector.broadcast %cst_6 : f32 to vector<16x128xf32>
    %10 = arith.mulf %6, %9 : vector<16x128xf32>
    %11 = math.erf %10 : vector<16x128xf32>
    %cst_7 = arith.constant 1.000000e+00 : f32
    %12 = vector.broadcast %cst_7 : f32 to vector<16x128xf32>
    %13 = arith.addf %12, %11 : vector<16x128xf32>
    %14 = arith.mulf %8, %13 : vector<16x128xf32>
    %15 = arith.truncf %14 : vector<16x128xf32> to vector<16x128xbf16>
    %c0_8 = arith.constant 0 : index
    %c0_9 = arith.constant 0 : index
    %16 = vector.load %arg4[%c0_8, %c0_9] : memref<128x128xbf16, #tpu.memory_space<vmem>>, vector<128x128xbf16>
    %c0_10 = arith.constant 0 : index
    %c0_11 = arith.constant 0 : index
    %17 = vector.load %arg5[%c0_10, %c0_11] : memref<1x128xf32, #tpu.memory_space<vmem>>, vector<1x128xf32>
    %cst_12 = arith.constant dense<0.000000e+00> : vector<16x128xf32>
    %18 = tpu.matmul %15, %16, %cst_12 {dimension_numbers = #tpu.dot_dimension_numbers<[1], [0], [0], [1], [0, 0, 1, 1], [], []>} : vector<16x128xbf16>, vector<128x128xbf16>, vector<16x128xf32> -> vector<16x128xf32>
    %19 = vector.broadcast %17 : vector<1x128xf32> to vector<16x128xf32>
    %20 = arith.addf %18, %19 : vector<16x128xf32>
    %21 = arith.negf %20 : vector<16x128xf32>
    %22 = math.exp %21 : vector<16x128xf32>
    %cst_13 = arith.constant 1.000000e+00 : f32
    %23 = vector.broadcast %cst_13 : f32 to vector<16x128xf32>
    %24 = arith.addf %23, %22 : vector<16x128xf32>
    %25 = arith.divf %23, %24 : vector<16x128xf32>
    %cst_14 = arith.constant dense<0.000000e+00> : vector<16xf32>
    %26 = vector.multi_reduction <add>, %25, %cst_14 [1] : vector<16x128xf32> to vector<16xf32>
    %27 = vector.shape_cast %26 : vector<16xf32> to vector<16x1xf32>
    %28 = tpu.reciprocal %27 : vector<16x1xf32> -> vector<16x1xf32>
    %29 = vector.broadcast %28 : vector<16x1xf32> to vector<16x128xf32>
    %30 = arith.mulf %25, %29 : vector<16x128xf32>
    %c0_15 = arith.constant 0 : index
    %c0_16 = arith.constant 0 : index
    %31 = vector.load %arg6[%c0_15, %c0_16] : memref<16x128xf32, #tpu.memory_space<vmem>>, vector<16x128xf32>
    tpu.vector_store %arg6[%c0_15, %c0_16], %30 {strides = array<i32>} : memref<16x128xf32, #tpu.memory_space<vmem>>, vector<16x128xf32>,
    return
  }
  func.func @transform_0(%arg0: i32) -> (i32, i32) {
    %c0_i32 = arith.constant 0 : i32
    %c0_i32_0 = arith.constant 0 : i32
    return %arg0, %c0_i32 : i32, i32
  }
  func.func @transform_1(%arg0: i32) -> (i32, i32) {
    %c0_i32 = arith.constant 0 : i32
    %c0_i32_0 = arith.constant 0 : i32
    %c0_i32_1 = arith.constant 0 : i32
    return %c0_i32, %c0_i32_0 : i32, i32
  }
  func.func @transform_2(%arg0: i32) -> (i32, i32) {
    %c0_i32 = arith.constant 0 : i32
    %c0_i32_0 = arith.constant 0 : i32
    %c0_i32_1 = arith.constant 0 : i32
    return %c0_i32, %c0_i32_0 : i32, i32
  }
  func.func @transform_3(%arg0: i32) -> (i32, i32) {
    %c0_i32 = arith.constant 0 : i32
    %c0_i32_0 = arith.constant 0 : i32
    %c0_i32_1 = arith.constant 0 : i32
    return %c0_i32, %c0_i32_0 : i32, i32
  }
  func.func @transform_4(%arg0: i32) -> (i32, i32) {
    %c0_i32 = arith.constant 0 : i32
    %c0_i32_0 = arith.constant 0 : i32
    %c0_i32_1 = arith.constant 0 : i32
    return %c0_i32, %c0_i32_0 : i32, i32
  }
  func.func @transform_5(%arg0: i32) -> (i32, i32) {
    %c0_i32 = arith.constant 0 : i32
    %c0_i32_0 = arith.constant 0 : i32
    return %arg0, %c0_i32 : i32, i32
  }
}

</mosaic_0001>

<bundles_post_ra>
// kernel: tpu_custom_call.1
= control target key start
LH: loop header
LB: loop body
LE: loop exit
PB: predicated region body
PF: predicated region fallthrough
CT: control target
= control target key end

     0   :  { %10 = vsyncpa [#allocation3], 0  ;;  %s588_s0 = inlined_call_operand.hbm [shape: f32[16,32], index: 0, kind: input, shape index: {}]   ;;  %s589_s1 = inlined_call_operand.hbm [shape: bf16[32,128], index: 1, kind: input, shape index: {}]   ;;  %s590_s2 = inlined_call_operand.vmem [shape: f32[1,128], index: 2, kind: input, shape index: {}]   ;;  %s591_s3 = inlined_call_operand.hbm [shape: bf16[128,128], index: 3, kind: input, shape index: {}]   ;;  %s592_s4 = inlined_call_operand.vmem [shape: f32[1,128], index: 4, kind: input, shape index: {}]   ;;  %s593_s5 = inlined_call_operand.hbm [shape: f32[16,128], index: 5, kind: output, shape index: {}]  }
   0x1   :  { %11 = vsyncpa [#allocation6], 0 }
   0x2   :  { %12 = vsyncpa [#allocation4], 0  ;;  %s482_s18 = smov [#allocation5]   ;;  %s388_s22 = scalar_lea.hbm %s589_s1, 256 }
   0x3   :  { %s30_s19 = sshll.u32 %s482_s18, 4  ;;  %p389_p0 = scmp.ne.s32.totalorder %s589_s1, %s388_s22  ;;  %s31_s19 = int_to_ptr.vmem [resolvable:$true] %s30_s19 }
   0x4   :  { %p392_p1 = scmp.lt.u32.totalorder %s388_s22, %s589_s1 }
   0x6   :  { %p394_p2 = pnand %p392_p1, %p389_p0 }
   0x8   :  { %397 = shalt.err (!%p394_p2)
}
   0x9   :  { %s398_s27 = scalar_lea.vmem %s31_s19, 256  ;;  %p403_p4 = scmp.lt.s32.totalorder %s31_s19, %s31_s19 }
   0xa   :  { %p399_p3 = scmp.ne.s32.totalorder %s31_s19, %s398_s27  ;;  %p404_p5 = scmp.lt.s32.totalorder %s398_s27, %s398_s27 }
   0xc   :  { %p405_p6 = por %p404_p5, %p403_p4 }
   0xe   :  { %p406_p7 = pnand %p405_p6, %p399_p3 }
  0x10   :  { %409 = shalt.err (!%p406_p7)
}
  0x11   :  { %s483_s28 = smov 64   ;;  %s484_s29 = smov 4  }
  0x12   :  { %36 = dma.hbm_to_vmem [thread:$0]  %s589_s1, 256, %s31_s19, [#allocation6], %s483_s28, %s483_s28, %s484_s29  }
  0x13   :  { %s485_s7 = smov [#allocation2]   ;;  %s410_s11 = scalar_lea.hbm %s588_s0, 256 }
  0x14   :  { %s18_s8 = sshll.u32 %s485_s7, 4  ;;  %p411_p8 = scmp.ne.s32.totalorder %s588_s0, %s410_s11  ;;  %s19_s8 = int_to_ptr.vmem [resolvable:$true] %s18_s8 }
  0x15   :  { %p414_p9 = scmp.lt.u32.totalorder %s410_s11, %s588_s0 }
  0x17   :  { %p416_p10 = pnand %p414_p9, %p411_p8 }
  0x19   :  { %419 = shalt.err (!%p416_p10)
}
  0x1a   :  { %s420_s16 = scalar_lea.vmem %s19_s8, 256  ;;  %p425_p12 = scmp.lt.s32.totalorder %s19_s8, %s19_s8 }
  0x1b   :  { %p421_p11 = scmp.ne.s32.totalorder %s19_s8, %s420_s16  ;;  %p426_p13 = scmp.lt.s32.totalorder %s420_s16, %s420_s16 }
  0x1d   :  { %p427_p0 = por %p426_p13, %p425_p12 }
  0x1f   :  { %p428_p1 = pnand %p427_p0, %p421_p11 }
  0x21   :  { %431 = shalt.err (!%p428_p1)
}
  0x22   :  { %s486_s1 = smov 128   ;;  %s487_s17 = smov 8  }
  0x23   :  { %24 = dma.hbm_to_vmem [thread:$0]  %s588_s0, 256, %s19_s8, [#allocation3], %s486_s1, %s486_s1, %s487_s17  }
  0x24   :  { %s488_s20 = smov [#allocation7]   ;;  %s432_s24 = scalar_lea.hbm %s591_s3, 1024 }
  0x25   :  { %s44_s21 = sshll.u32 %s488_s20, 4  ;;  %p433_p2 = scmp.ne.s32.totalorder %s591_s3, %s432_s24  ;;  %s45_s21 = int_to_ptr.vmem [resolvable:$true] %s44_s21 }
  0x26   :  { %p436_p3 = scmp.lt.u32.totalorder %s432_s24, %s591_s3 }
  0x28   :  { %p438_p4 = pnand %p436_p3, %p433_p2 }
  0x2a   :  { %441 = shalt.err (!%p438_p4)
}
  0x2b   :  { %s442_s6 = scalar_lea.vmem %s45_s21, 1024  ;;  %p447_p6 = scmp.lt.s32.totalorder %s45_s21, %s45_s21 }
  0x2c   :  { %p443_p5 = scmp.ne.s32.totalorder %s45_s21, %s442_s6  ;;  %p448_p7 = scmp.lt.s32.totalorder %s442_s6, %s442_s6 }
  0x2e   :  { %p449_p8 = por %p448_p7, %p447_p6 }
  0x30   :  { %p450_p9 = pnand %p449_p8, %p443_p5 }
  0x32   :  { %453 = shalt.err (!%p450_p9)
}
  0x33   :  { %50 = dma.hbm_to_vmem [thread:$0]  %s591_s3, 1024, %s45_s21, [#allocation6], %s483_s28, %s483_s28, %s484_s29  }
  0x34   :  { %476 = dma.done.wait [#allocation3], 256  }
  0x35   :  { %477 = vsyncadd [#allocation3], 4294967040 }
  0x36   :  { %478 = dma.done.wait [#allocation6], 1280  }
  0x37   :  { %479 = vsyncadd [#allocation6], 4294966016  ;;  %v489_v0 = vmov 0.0   ;;  %vm490_vm0 = vmmov 0   ;;  %v362_v1 = vld [vmem:[#allocation5] sm:$0xff]   ;;  %v363_v2 = vld [vmem:[#allocation5 + $0x8] sm:$0xff]  }
  0x38   :  { %324 = vmatprep.subr.bf16.mxu0 %v489_v0  ;;  %328 = vmatprep.mubr.msk.bf16.mxu0 %vm490_vm0, %v489_v0  ;;  %v63_v3 = vld [vmem:[#allocation2] sm:$0xff]  ;;  %v64_v4 = vld [vmem:[#allocation2 + $0x8] sm:$0xff]  ;;  %vm89_vm1 = vcmask 261120   ;;  %v366_v8 = vld [vmem:[#allocation7 + $0x10] sm:$0xff]  }
  0x39   :  { %332 = vmatprep.subr.bf16.mxu1 %v489_v0  ;;  %348 = vmatprep.mubr.msk.bf16.mxu1 %vm490_vm0, %v489_v0  ;;  %v364_v5 = vld [vmem:[#allocation7] sm:$0xff]   ;;  %v365_v6 = vld [vmem:[#allocation7 + $0x8] sm:$0xff]   ;;  %v65_v7 = vpack.c.bf16 %v64_v4, %v63_v3  ;;  %v367_v9 = vld [vmem:[#allocation7 + $0x18] sm:$0xff]  }
  0x3a   :  { %325 = vmatpush3.bf16.msra.mxu0 %v362_v1  ;;  %333 = vmatpush3.bf16.msra.mxu1 %v364_v5  ;;  %v368_v10 = vld [vmem:[#allocation7 + $0x20] sm:$0xff]   ;;  %v369_v11 = vld [vmem:[#allocation7 + $0x28] sm:$0xff]   ;;  %v370_v12 = vld [vmem:[#allocation7 + $0x30] sm:$0xff]  }
  0x3b   :  { %326 = vmatprep.subr.bf16.mxu0 %v489_v0  ;;  %334 = vmatprep.subr.bf16.mxu1 %v489_v0  ;;  %v371_v13 = vld [vmem:[#allocation7 + $0x38] sm:$0xff]   ;;  %v297_v14 = vld [vmem:[%s590_s2] ss:$0 sm:$0xff] }
  0x3c   :  { %v301_v32 = vld [vmem:[%s592_s4] ss:$0 sm:$0xff]  ;;  %s491_s4 = smov [#allocation8]  }
  0x3d   :  { %s284_s8 = sshll.u32 %s491_s4, 4  ;;  %s285_s8 = int_to_ptr.vmem [resolvable:$true] %s284_s8 }
  0x3e   :  { %327 = vmatpush3.bf16.msra.mxu0 %v363_v2  ;;  %335 = vmatpush3.bf16.msra.mxu1 %v365_v6  ;;  %s454_s9 = scalar_lea.vmem %s285_s8, 256  ;;  %p459_p11 = scmp.lt.s32.totalorder %s285_s8, %s285_s8 }
  0x3f   :  { %336 = vmatprep.subr.bf16.mxu1 %v489_v0  ;;  %p455_p10 = scmp.ne.s32.totalorder %s285_s8, %s454_s9  ;;  %p460_p12 = scmp.lt.s32.totalorder %s454_s9, %s454_s9 }
  0x41   :  { %329 = vmatmul.mubr.msk.bf16.vlgmr.msra.gmra.mrb[0].mxu0 %vm89_vm1, %v65_v7  ;;  %p461_p13 = por %p460_p12, %p459_p11 }
  0x42   :  { %337 = vmatpush3.bf16.msra.mxu1 %v366_v8 }
  0x43   :  { %338 = vmatprep.subr.bf16.mxu1 %v489_v0  ;;  %p462_p0 = pnand %p461_p13, %p455_p10 }
  0x46   :  { %339 = vmatpush3.bf16.msra.mxu1 %v367_v9 }
  0x47   :  { %340 = vmatprep.subr.bf16.mxu1 %v489_v0 }
  0x4a   :  { %341 = vmatpush3.bf16.msra.mxu1 %v368_v10 }
  0x4b   :  { %342 = vmatprep.subr.bf16.mxu1 %v489_v0 }
  0x4e   :  { %343 = vmatpush3.bf16.msra.mxu1 %v369_v11 }
  0x4f   :  { %344 = vmatprep.subr.bf16.mxu1 %v489_v0 }
  0x52   :  { %345 = vmatpush3.bf16.msra.mxu1 %v370_v12 }
  0x53   :  { %346 = vmatprep.subr.bf16.mxu1 %v489_v0 }
  0x56   :  { %347 = vmatpush3.bf16.msra.mxu1 %v371_v13 }
 0x114   :  { %v127_v15 = vpop.f32.mrb[0].mxu0 }
 0x115   :  { %v128_v16 = vadd.f32 %v297_v14, %v127_v15  ;;  %v330_v17 = vpop.f32.mrb[1].mxu0 }
 0x116   :  { %v130_v18 = vpop.f32.mrb[2].mxu0 }
 0x117   :  { %v136_v19 = vmul.f32 0.70710677, %v128_v16  ;;  %v131_v20 = vadd.f32 %v297_v14, %v130_v18  ;;  %v331_v21 = vpop.f32.mrb[3].mxu0  ;;  %v134_v26 = vmul.f32 0.5, %v128_v16 }
 0x119   :  { %372 = verf.f32 %v136_v19  ;;  %v137_v22 = vmul.f32 0.70710677, %v131_v20  ;;  %v135_v27 = vmul.f32 0.5, %v131_v20 }
 0x11b   :  { %374 = verf.f32 %v137_v22 }
 0x123   :  { %v373_v23 = vpop.eup %372 }
 0x124   :  { %v140_v24 = vadd.f32 1.0, %v373_v23 }
 0x125   :  { %v375_v25 = vpop.eup %374 }
 0x126   :  { %v141_v28 = vadd.f32 1.0, %v375_v25  ;;  %v142_v29 = vmul.f32 %v140_v24, %v134_v26 }
 0x128   :  { %v143_v30 = vmul.f32 %v141_v28, %v135_v27 }
 0x12a   :  { %v144_v31 = vpack.c.bf16 %v143_v30, %v142_v29 }
 0x12c   :  { %349 = vmatmul.mubr.bf16.vlgmr.msra.gmra.mrb[0].mxu1 %v144_v31 }
 0x1ff   :  { %v250_v33 = vpop.f32.mrb[0].mxu1 }
 0x200   :  { %v251_v34 = vadd.f32 %v301_v32, %v250_v33  ;;  %v350_v35 = vpop.f32.mrb[1].mxu1 }
 0x201   :  { %v253_v36 = vpop.f32.mrb[2].mxu1 }
 0x202   :  { %v310_v37 = vmul.f32 -1.442695, %v251_v34  ;;  %v254_v38 = vadd.f32 %v301_v32, %v253_v36  ;;  %v351_v39 = vpop.f32.mrb[3].mxu1 }
 0x204   :  { %376 = vpow2.f32 %v310_v37  ;;  %v311_v40 = vmul.f32 -1.442695, %v254_v38 }
 0x206   :  { %378 = vpow2.f32 %v311_v40 }
 0x20e   :  { %v377_v41 = vpop.eup %376 }
 0x20f   :  { %v263_v42 = vadd.f32 1.0, %v377_v41 }
 0x210   :  { %v379_v43 = vpop.eup %378 }
 0x211   :  { %380 = vrcp.f32 %v263_v42  ;;  %v264_v44 = vadd.f32 1.0, %v379_v43 }
 0x213   :  { %382 = vrcp.f32 %v264_v44 }
 0x21b   :  { %v381_v45 = vpop.eup %380 }
 0x21c   :  { %269 = vadd.xlane.f32.xlu0 %v381_v45 }
 0x21d   :  { %v383_v46 = vpop.eup %382 }
 0x220   :  { %271 = vadd.xlane.f32.xlu0 %v383_v46 }
 0x2a9   :  { %v270_v47 = vpop.xlane.xlu0 %269 }
 0x2aa   :  { %384 = vrcp.f32 %v270_v47 }
 0x2ad   :  { %v272_v48 = vpop.xlane.xlu0 %271 }
 0x2ae   :  { %386 = vrcp.f32 %v272_v48 }
 0x2b4   :  { %v385_v49 = vpop.eup %384 }
 0x2b5   :  { %v275_v50 = vmul.f32 %v385_v49, %v381_v45 }
 0x2b7   :  { %277 = vst [vmem:[#allocation8] sm:$0xff] %v275_v50 }
 0x2b8   :  { %v387_v51 = vpop.eup %386 }
 0x2b9   :  { %v276_v52 = vmul.f32 %v387_v51, %v383_v46 }
 0x2bb   :  { %278 = vst [vmem:[#allocation8 + $0x8] sm:$0xff] %v276_v52 }
 0x2bc   :  { %465 = shalt.err (!%p462_p0)
}
 0x2bd   :  { %s466_s12 = scalar_lea.hbm %s593_s5, 256 }
 0x2be   :  { %p467_p1 = scmp.ne.s32.totalorder %s593_s5, %s466_s12  ;;  %p470_p2 = scmp.lt.u32.totalorder %s466_s12, %s593_s5 }
 0x2c0   :  { %p472_p3 = pnand %p470_p2, %p467_p1 }
 0x2c2   :  { %475 = shalt.err (!%p472_p3)
}
 0x2c3   :  { %290 = dma.vmem_to_hbm [thread:$0]  %s285_s8, 256, %s593_s5, [#allocation4], %s486_s1, %s486_s1, %s487_s17  }
 0x2c4   :  { %480 = dma.done.wait [#allocation4], 256  }
 0x2c5   :  { %481 = vsyncadd [#allocation4], 4294967040 }
 0x2c6   :  { %294 = vsyncpa [#allocation3], 1 }
 0x2c7   :  { %295 = vsyncpa [#allocation6], 1 }
 0x2c8   :  { %296 = vsyncpa [#allocation4], 1 }

</bundles_post_ra>
